<compile_context>
chip_gen: v6e
topology: v6e:2x2x1
jax: 0.10.0
libtpu: 0.0.40
codegen_flags: <defaults>
</compile_context>

<pallas_src>
import math
from functools import partial

import jax
import jax.numpy as jnp
from jax import lax
from jax.experimental import pallas as pl
from jax.experimental.pallas import tpu as pltpu


def _build_pe_table(d_model: int, max_len: int) -> jnp.ndarray:
    """Deterministic positional-encoding buffer, identical to the PyTorch init."""
    position = jnp.arange(0, max_len, dtype=jnp.float32)[:, None]          # (L, 1)
    div_term = jnp.exp(jnp.arange(0, d_model, 2, dtype=jnp.float32)
                       * (-math.log(10000.0) / d_model))                   # (D/2,)
    sin = jnp.sin(position * div_term)                                     # (L, D/2)
    cos = jnp.cos(position * div_term)                                     # (L, D/2)
    # interleave: columns 0::2 = sin, 1::2 = cos
    pe = jnp.stack([sin, cos], axis=-1).reshape(max_len, d_model)
    return pe.astype(jnp.float32)


def _pos_enc_kernel(seed_ref, x_ref, pe_ref, o_ref, *, p, training, tile_c, row_len):
    # x_ref / o_ref: (B, TILE_C) block; pe_ref: (1, TILE_C) block (sublane
    # broadcast over the batch rows -- no [None, :, :] needed).
    y = x_ref[...] + pe_ref[...]

    if training and p > 0.0:
        # Inverted dropout with a counter-based hash RNG (portable: lowers on
        # TPU and in interpret mode, unlike the stateful pltpu PRNG).
        shape = y.shape
        rows = lax.broadcasted_iota(jnp.int32, shape, 0)
        cols = lax.broadcasted_iota(jnp.int32, shape, 1)
        gcol = cols + pl.program_id(0) * tile_c            # global column index
        gidx = rows * row_len + gcol                       # unique per element
        seed_u = seed_ref[0].astype(jnp.uint32)

        k = gidx.astype(jnp.uint32) + seed_u * jnp.uint32(0x9E3779B9)
        # murmur3 fmix32 finalizer (good avalanche, pure VPU int ops)
        k = k ^ (k >> 16)
        k = k * jnp.uint32(0x85EBCA6B)
        k = k ^ (k >> 13)
        k = k * jnp.uint32(0xC2B2AE35)
        k = k ^ (k >> 16)

        # Drop with probability p: integer-threshold compare (no float convert).
        threshold = jnp.uint32(int(p * (2.0 ** 32)))
        keep = k >= threshold
        inv_keep = 1.0 / (1.0 - p)
        y = jnp.where(keep, y * inv_keep, 0.0)

    o_ref[...] = y.astype(o_ref.dtype)


def positional_encoding(x, pe, *, p=0.1, training=False, seed=0):
    """x: (B, S, D) float array; pe: (max_len, D) table. Returns (B, S, D)."""
    B, S, D = x.shape
    C = S * D

    # Glue: slice table to current seq len, match x dtype, flatten lane-dense.
    pe_flat = pe[:S, :].astype(x.dtype).reshape(1, C)
    x2 = x.reshape(B, C)
    seed_arr = jnp.asarray([seed], dtype=jnp.int32)

    # Tile the flattened row axis. Cap each x/out block at ~2 MiB of f32 so
    # double-buffered in + out + pe fits every generation's default scoped
    # VMEM (16 MiB on v5e, 32 MiB on v6e/v7x) with headroom.
    LANE = 128
    if C % LANE == 0:
        max_block_elems = 512 * 1024                       # ~2 MiB f32 per block
        cols_budget = max(LANE, ((max_block_elems // max(B, 1)) // LANE) * LANE)
        tile_c = min(C, cols_budget)
    else:
        tile_c = C                                         # full extent is always legal
    grid_c = pl.cdiv(C, tile_c)

    kernel = partial(_pos_enc_kernel, p=float(p), training=bool(training),
                     tile_c=int(tile_c), row_len=int(C))

    out2 = pl.pallas_call(
        kernel,
        out_shape=jax.ShapeDtypeStruct((B, C), x.dtype),
        grid_spec=pltpu.PrefetchScalarGridSpec(
            num_scalar_prefetch=1,
            grid=(grid_c,),
            in_specs=[
                pl.BlockSpec((B, tile_c), lambda j, seed: (0, j)),
                pl.BlockSpec((1, tile_c), lambda j, seed: (0, j)),
            ],
            out_specs=pl.BlockSpec((B, tile_c), lambda j, seed: (0, j)),
        ),
        compiler_params=pltpu.CompilerParams(
            dimension_semantics=("parallel",),
        ),
    )(seed_arr, x2, pe_flat)

    return out2.reshape(B, S, D)


if __name__ == "__main__":
    # Small shapes consistent with the module: (batch, seq, d_model)
    B, S, D = 2, 8, 32
    MAX_LEN = 64

    key = jax.random.PRNGKey(0)
    x = jax.random.normal(key, (B, S, D), dtype=jnp.float32)

    pe = _build_pe_table(D, MAX_LEN)
    ref = x + pe[:S, :][None, :, :]

    # Eval-mode forward (dropout is identity), matching module.eval() semantics.
    out = jax.block_until_ready(positional_encoding(x, pe, p=0.1, training=False))
    assert out.shape == (B, S, D) and out.dtype == x.dtype
    assert jnp.allclose(out, ref, atol=1e-6, rtol=1e-6)

    # Training-mode path: inverted dropout. Deterministic structural check:
    # every element is either exactly 0 (dropped) or (x+pe)/(1-p) (kept).
    p = 0.1
    out_tr = jax.block_until_ready(
        positional_encoding(x, pe, p=p, training=True, seed=123)
    )
    assert out_tr.shape == (B, S, D)
    scaled = ref * (1.0 / (1.0 - p))
    dropped = out_tr == 0.0
    kept_ok = jnp.isclose(out_tr, scaled, atol=1e-5, rtol=1e-5)
    assert bool(jnp.all(dropped | kept_ok))
    keep_frac = 1.0 - float(jnp.mean(dropped.astype(jnp.float32)))
    assert 0.75 <= keep_frac <= 0.98  # ~0.9 expected; loose deterministic bound

    print("KERNEL_OK")
</pallas_src>

<mosaic_0001>
module attributes {stable_mosaic.version = 11 : i64} {
  func.func @_pos_enc_kernel(%arg0: i32, %arg1: memref<1xi32, #tpu.memory_space<smem>>, %arg2: memref<2x256xf32, #tpu.memory_space<vmem>>, %arg3: memref<1x256xf32, #tpu.memory_space<vmem>>, %arg4: memref<2x256xf32, #tpu.memory_space<vmem>>) attributes {dimension_semantics = [#tpu.dimension_semantics<parallel>], iteration_bounds = array<i64: 1>, scalar_prefetch = 1 : i64, scratch_operands = 0 : i64, tpu.core_type = #tpu.core_type<tc>, window_params = [{transform_indices = @transform_0, window_bounds = array<i64: 2, 256>}, {transform_indices = @transform_1, window_bounds = array<i64: 1, 256>}, {transform_indices = @transform_2, window_bounds = array<i64: 2, 256>}]} {
    %c0 = arith.constant 0 : index
    %c0_0 = arith.constant 0 : index
    %0 = vector.load %arg2[%c0, %c0_0] : memref<2x256xf32, #tpu.memory_space<vmem>>, vector<2x256xf32>
    %c0_1 = arith.constant 0 : index
    %c0_2 = arith.constant 0 : index
    %1 = vector.load %arg3[%c0_1, %c0_2] : memref<1x256xf32, #tpu.memory_space<vmem>>, vector<1x256xf32>
    %2 = vector.broadcast %1 : vector<1x256xf32> to vector<2x256xf32>
    %3 = arith.addf %0, %2 : vector<2x256xf32>
    %c0_3 = arith.constant 0 : index
    %c0_4 = arith.constant 0 : index
    %4 = vector.load %arg4[%c0_3, %c0_4] : memref<2x256xf32, #tpu.memory_space<vmem>>, vector<2x256xf32>
    tpu.vector_store %arg4[%c0_3, %c0_4], %3 {strides = array<i32>} : memref<2x256xf32, #tpu.memory_space<vmem>>, vector<2x256xf32>,
    return
  }
  func.func @transform_0(%arg0: i32, %arg1: memref<1xi32, #tpu.memory_space<smem>>) -> (i32, i32) {
    %c0_i32 = arith.constant 0 : i32
    %c0_i32_0 = arith.constant 0 : i32
    return %c0_i32, %arg0 : i32, i32
  }
  func.func @transform_1(%arg0: i32, %arg1: memref<1xi32, #tpu.memory_space<smem>>) -> (i32, i32) {
    %c0_i32 = arith.constant 0 : i32
    %c0_i32_0 = arith.constant 0 : i32
    return %c0_i32, %arg0 : i32, i32
  }
  func.func @transform_2(%arg0: i32, %arg1: memref<1xi32, #tpu.memory_space<smem>>) -> (i32, i32) {
    %c0_i32 = arith.constant 0 : i32
    %c0_i32_0 = arith.constant 0 : i32
    return %c0_i32, %arg0 : i32, i32
  }
}

</mosaic_0001>

<bundles_post_ra>
// kernel: tpu_custom_call.1
= control target key start
LH: loop header
LB: loop body
LE: loop exit
PB: predicated region body
PF: predicated region fallthrough
CT: control target
= control target key end

     0   :  { %9 = vsyncpa [#allocation5], 0  ;;  %s142_s0 = inlined_call_operand.<no memory space> [shape: s32[1], index: 0, kind: input, shape index: {}]   ;;  %s143_s1 = inlined_call_operand.hbm [shape: f32[2,256], index: 1, kind: input, shape index: {}]   ;;  %s144_s2 = inlined_call_operand.vmem [shape: f32[1,256], index: 2, kind: input, shape index: {}]   ;;  %s145_s3 = inlined_call_operand.hbm [shape: f32[2,256], index: 3, kind: output, shape index: {}]  }
   0x1   :  { %10 = vsyncpa [#allocation6], 0  ;;  %s110_s12 = smov [#allocation4]  }
   0x2   :  { %s17_s13 = sshll.u32 %s110_s12, 4  ;;  %s18_s13 = int_to_ptr.vmem [resolvable:$true] %s17_s13 }
   0x3   :  { %s74_s14 = scalar_lea.vmem %s18_s13, 64  ;;  %p79_p1 = scmp.lt.s32.totalorder %s18_s13, %s18_s13 }
   0x4   :  { %p75_p0 = scmp.ne.s32.totalorder %s18_s13, %s74_s14  ;;  %p80_p2 = scmp.lt.s32.totalorder %s74_s14, %s74_s14 }
   0x6   :  { %p81_p3 = por %p80_p2, %p79_p1 }
   0x8   :  { %p82_p4 = pnand %p81_p3, %p75_p0 }
   0xa   :  { %85 = shalt.err (!%p82_p4)
}
   0xb   :  { %20 = dma.hbm_to_vmem [thread:$0]  %s143_s1, 64, %s18_s13, [#allocation5]  }
   0xc   :  { %106 = dma.done.wait [#allocation5], 64  }
   0xd   :  { %107 = vsyncadd [#allocation5], 4294967232  ;;  %v29_v0 = vlaneseq  ;;  %v111_v1 = vmov 1983009808   ;;  %v27_v7 = vld [vmem:[%s144_s2] sm:$0x3] }
   0xe   :  { %v39_v2 = vunpack.c.l.s4 %v111_v1  ;;  %v26_v12 = vld [vmem:[#allocation4] sm:$0xf]  ;;  %s112_s18 = smov [#allocation7]  }
   0xf   :  { %v30_v3 = vshrl.u32 %v29_v0, 7  ;;  %s54_s1 = sshll.u32 %s112_s18, 4  ;;  %s55_s1 = int_to_ptr.vmem [resolvable:$true] %s54_s1 }
  0x10   :  { %v40_v6 = vunpack.c.0.s8 %v39_v2  ;;  %s86_s19 = scalar_lea.vmem %s55_s1, 64  ;;  %p91_p6 = scmp.lt.s32.totalorder %s55_s1, %s55_s1 }
  0x11   :  { %v31_v4 = vsub.s32 0, %v30_v3  ;;  %v35_v5 = vsub.s32 1, %v30_v3  ;;  %p87_p5 = scmp.ne.s32.totalorder %s55_s1, %s86_s19  ;;  %p92_p7 = scmp.lt.s32.totalorder %s86_s19, %s86_s19 }
  0x12   :  { %v43_v10 = vsub.s32 %v40_v6, %v30_v3 }
  0x13   :  { %v32_v8 = vrot.slane %v27_v7, %v31_v4  ;;  %v36_v9 = vrot.slane %v27_v7, %v35_v5  ;;  %p93_p8 = por %p92_p7, %p91_p6 }
  0x15   :  { %v37_v11 = vcombine.low %v32_v8, %v36_v9  ;;  %p94_p9 = pnand %p93_p8, %p87_p5 }
  0x17   :  { %v44_v13 = vrot.slane %v37_v11, %v43_v10 }
  0x19   :  { %v46_v14 = vadd.f32 %v44_v13, %v26_v12 }
  0x1b   :  { %47 = vst [vmem:[#allocation7] sm:$0xf] %v46_v14 }
  0x1c   :  { %97 = shalt.err (!%p94_p9)
}
  0x1d   :  { %57 = dma.vmem_to_hbm [thread:$0]  %s55_s1, 64, %s145_s3, [#allocation6]  }
  0x1e   :  { %108 = dma.done.wait [#allocation6], 64  }
  0x1f   :  { %109 = vsyncadd [#allocation6], 4294967232 }
  0x20   :  { %61 = vsyncpa [#allocation5], 1 }
  0x21   :  { %62 = vsyncpa [#allocation6], 1 }

</bundles_post_ra>
